<compile_context>
chip_gen: v5e
topology: v5e:2x2
jax: 0.10.0
libtpu: 0.0.40
codegen_flags: <defaults>
</compile_context>

<pallas_src>
import functools

import jax
import jax.numpy as jnp
from jax.experimental import pallas as pl
from jax.experimental.pallas import tpu as pltpu


def _round_up(x, m):
    return (x + m - 1) // m * m


def _sublane_multiple(dtype):
    # packed sub-32-bit dtypes need 16 (bf16) / 32 (int8, fp8) sublanes per tile
    return {4: 8, 2: 16, 1: 32}.get(jnp.dtype(dtype).itemsize, 8)


def _param_spec(block_shape, index_map, single_buffer):
    """BlockSpec for grid-invariant params: single-buffered when requested."""
    if single_buffer:
        return pl.BlockSpec(block_shape, index_map,
                            pipeline_mode=pl.Buffered(1))
    return pl.BlockSpec(block_shape, index_map)


# ---------------------------------------------------------------------------
# Pass 1: QKV projection
# ---------------------------------------------------------------------------
def _qkv_kernel(x_ref, w_ref, b_ref, o_ref):
    # (tile_s, E) @ (E, 3E) on the MXU; native-dtype operands, f32 accumulate.
    y = jnp.dot(x_ref[0], w_ref[...], preferred_element_type=jnp.float32)
    o_ref[0] = (y + b_ref[...]).astype(o_ref.dtype)


# ---------------------------------------------------------------------------
# Pass 2: attention (online softmax over streamed K/V tiles) + fused out-proj
# ---------------------------------------------------------------------------
def _attn_proj_kernel(q_ref, k_ref, v_ref, bias_ref, wp_ref, bp_ref, o_ref,
                      m_sc, l_sc, acc_sc, *, num_heads, masked):
    ki = pl.program_id(2)

    @pl.when(ki == 0)
    def _():
        m_sc[...] = jnp.full(m_sc.shape, -jnp.inf, m_sc.dtype)
        l_sc[...] = jnp.zeros(l_sc.shape, l_sc.dtype)
        acc_sc[...] = jnp.zeros(acc_sc.shape, acc_sc.dtype)

    q = q_ref[0]                                    # (H, tq, D) — scale pre-folded
    k = k_ref[0]                                    # (H, tk, D)
    v = v_ref[0]                                    # (H, tk, D)

    # Batched-over-heads q @ k^T.  Contracting dim is the LAST dim of both
    # operands -> no materialized transpose (no per-head vxpose).
    s = jnp.einsum('hqd,hkd->hqk', q, k,
                   preferred_element_type=jnp.float32)          # (H, tq, tk)
    if masked:
        # additive key-padding bias row (0 valid / -1e30 padded), one VPU add
        s = s + bias_ref[...]

    m_prev = m_sc[...]
    m_new = jnp.maximum(m_prev, s.max(axis=-1, keepdims=True))
    alpha = jnp.exp(m_prev - m_new)
    p = jnp.exp(s - m_new)
    l_sc[...] = alpha * l_sc[...] + p.sum(axis=-1, keepdims=True)
    acc_sc[...] = alpha * acc_sc[...] + jnp.einsum(
        'hqk,hkd->hqd', p.astype(v.dtype), v,
        preferred_element_type=jnp.float32)
    m_sc[...] = m_new

    @pl.when(ki == pl.num_programs(2) - 1)
    def _():
        # Normalize (EUP reciprocal) and fuse the output projection:
        #   out = sum_h attn_h @ W_proj[h]
        # Head selection is a major-axis index (lane-aligned), the store is a
        # lane-dense (tq, E) slab, and a single running accumulator keeps the
        # live range bounded while the MXU gets back-to-back pushes.
        attn = acc_sc[...] * pl.reciprocal(l_sc[...], approx=True)  # (H, tq, D)
        attn = attn.astype(wp_ref.dtype)
        tq = attn.shape[1]
        e_out = wp_ref.shape[-1]
        out = jnp.zeros((tq, e_out), jnp.float32)
        for h in range(num_heads):
            out = out + jnp.dot(attn[h], wp_ref[h],
                                preferred_element_type=jnp.float32)
        o_ref[0] = (out + bp_ref[...]).astype(o_ref.dtype)


# ---------------------------------------------------------------------------
# Wrapper
# ---------------------------------------------------------------------------
def _mha_forward(x, w_qkv, b_qkv, w_proj, b_proj, *, num_heads, max_tile,
                 single_buffer_params):
    B, S, E = x.shape
    H = num_heads
    D = E // H
    assert D * H == E, "embed_dim must be divisible by num_heads"

    # ---- tiling (sublane multiple per dtype; cap at 256 for full MXU M) ----
    sub = _sublane_multiple(x.dtype)
    tile_s = _round_up(S, sub) if S <= max_tile else max_tile
    s_pad = _round_up(S, tile_s)
    masked = s_pad != S
    n_tiles = s_pad // tile_s
    x_p = x if not masked else jnp.pad(x, ((0, 0), (0, s_pad - S), (0, 0)))

    # ---- fold 1/sqrt(D) into the Q columns of W_qkv / b_qkv (trace time) ---
    scale = 1.0 / (D ** 0.5)
    col_scale = jnp.concatenate(
        [jnp.full((E,), scale, jnp.float32), jnp.ones((2 * E,), jnp.float32)])
    w_qkv_s = (w_qkv.astype(jnp.float32) * col_scale).astype(w_qkv.dtype)
    b_qkv_s = (b_qkv.astype(jnp.float32) * col_scale).astype(b_qkv.dtype)
    b_qkv2 = b_qkv_s.reshape(1, 3 * E)
    b_proj2 = b_proj.reshape(1, E)
    w_proj_h = w_proj.reshape(H, D, E)              # head-major projection weight

    # additive key-padding bias row (0 valid / -1e30 padded)
    key_bias = jnp.where(jnp.arange(s_pad) < S, 0.0, -1e30)
    key_bias = key_bias.astype(jnp.float32).reshape(1, s_pad)

    # ---- VMEM budget (per generation, score temporaries included) ----------
    itm = jnp.dtype(x.dtype).itemsize
    w_itm = jnp.dtype(w_qkv.dtype).itemsize
    lane = 128
    wbuf = 1 if single_buffer_params else 2
    qkv_foot = (2 * tile_s * E * itm                       # x block (dbl-buffered)
                + wbuf * (3 * E * E + 3 * E) * w_itm       # W_qkv + b_qkv
                + 2 * tile_s * 3 * E * itm)                # out block
    attn_foot = (2 * 3 * H * tile_s * D * itm              # q/k/v blocks
                 + 2 * tile_s * 4                          # key-pad bias row
                 + wbuf * (H * D * E + E) * w_itm          # W_proj + b_proj
                 + 2 * tile_s * E * itm                    # out block
                 + 2 * H * tile_s * lane * 4               # m / l scratch (padded)
                 + H * tile_s * max(D, lane) * 4           # acc scratch
                 + 3 * H * tile_s * tile_s * 4)            # transient f32 scores
    try:
        cap = pltpu.get_tpu_info().vmem_capacity_bytes     # 128 MiB v5e/v6e, 64 MiB v7x
    except Exception:
        cap = 128 * 2 ** 20
    def _limit(foot):
        return int(min(int(0.8 * cap), max(32 * 2 ** 20, 2 * foot)))

    # ---- pass 1: QKV projection --------------------------------------------
    qkv = pl.pallas_call(
        _qkv_kernel,
        out_shape=jax.ShapeDtypeStruct((B, s_pad, 3 * E), x.dtype),
        grid_spec=pltpu.PrefetchScalarGridSpec(
            num_scalar_prefetch=0,
            grid=(B, n_tiles),
            in_specs=[
                pl.BlockSpec((1, tile_s, E), lambda b, i: (b, i, 0)),
                _param_spec((E, 3 * E), lambda b, i: (0, 0), single_buffer_params),
                _param_spec((1, 3 * E), lambda b, i: (0, 0), single_buffer_params),
            ],
            out_specs=pl.BlockSpec((1, tile_s, 3 * E), lambda b, i: (b, i, 0)),
        ),
        compiler_params=pltpu.CompilerParams(
            dimension_semantics=("parallel", "parallel"),
            vmem_limit_bytes=_limit(qkv_foot)),
    )(x_p, w_qkv_s, b_qkv2)

    # head-major split (XLA layout plumbing, outside the kernels)
    qkv = qkv.reshape(B, s_pad, 3, H, D)
    qkv = jnp.transpose(qkv, (2, 0, 3, 1, 4))       # (3, B, H, s_pad, D)
    q, k, v = qkv[0], qkv[1], qkv[2]

    # ---- pass 2: attention + fused output projection ------------------------
    kernel = functools.partial(_attn_proj_kernel, num_heads=H, masked=masked)
    out = pl.pallas_call(
        kernel,
        out_shape=jax.ShapeDtypeStruct((B, s_pad, E), x.dtype),
        grid_spec=pltpu.PrefetchScalarGridSpec(
            num_scalar_prefetch=0,
            grid=(B, n_tiles, n_tiles),             # (batch, q tile, k tile)
            in_specs=[
                pl.BlockSpec((1, H, tile_s, D), lambda b, qi, ki: (b, 0, qi, 0)),
                pl.BlockSpec((1, H, tile_s, D), lambda b, qi, ki: (b, 0, ki, 0)),
                pl.BlockSpec((1, H, tile_s, D), lambda b, qi, ki: (b, 0, ki, 0)),
                pl.BlockSpec((1, tile_s), lambda b, qi, ki: (0, ki)),
                _param_spec((H, D, E), lambda b, qi, ki: (0, 0, 0),
                            single_buffer_params),
                _param_spec((1, E), lambda b, qi, ki: (0, 0),
                            single_buffer_params),
            ],
            out_specs=pl.BlockSpec((1, tile_s, E), lambda b, qi, ki: (b, qi, 0)),
            scratch_shapes=[
                pltpu.VMEM((H, tile_s, 1), jnp.float32),   # running max
                pltpu.VMEM((H, tile_s, 1), jnp.float32),   # running denominator
                pltpu.VMEM((H, tile_s, D), jnp.float32),   # running numerator
            ],
        ),
        compiler_params=pltpu.CompilerParams(
            dimension_semantics=("parallel", "parallel", "arbitrary"),
            vmem_limit_bytes=_limit(attn_foot)),
    )(q, k, v, key_bias, w_proj_h, b_proj2)

    return out if not masked else out[:, :S, :]


def multi_head_attention(x, w_qkv, b_qkv, w_proj, b_proj, *, num_heads,
                         max_tile=256):
    """x: (B, S, E). Returns (B, S, E). Matches the nn.Linear-based PyTorch MHA."""
    try:
        return _mha_forward(x, w_qkv, b_qkv, w_proj, b_proj,
                            num_heads=num_heads, max_tile=max_tile,
                            single_buffer_params=True)
    except Exception:
        # pl.Buffered(1) on grid-invariant params not supported by this
        # jax/libtpu combination -> default double-buffering.
        return _mha_forward(x, w_qkv, b_qkv, w_proj, b_proj,
                            num_heads=num_heads, max_tile=max_tile,
                            single_buffer_params=False)


def _reference_mha(x, w_qkv, b_qkv, w_proj, b_proj, num_heads):
    """Pure-JAX reference mirroring the PyTorch module semantics."""
    B, S, E = x.shape
    D = E // num_heads
    qkv = x @ w_qkv + b_qkv                                # (B, S, 3E)
    qkv = qkv.reshape(B, S, 3, num_heads, D)
    qkv = jnp.transpose(qkv, (2, 0, 3, 1, 4))              # (3, B, H, S, D)
    q, k, v = qkv[0], qkv[1], qkv[2]
    attn = jnp.einsum("bhqd,bhkd->bhqk", q, k) / (D ** 0.5)
    attn = jax.nn.softmax(attn, axis=-1)
    out = jnp.einsum("bhqk,bhkd->bhqd", attn, v)           # (B, H, S, D)
    out = jnp.transpose(out, (0, 2, 1, 3)).reshape(B, S, E)
    return out @ w_proj + b_proj


if __name__ == "__main__":
    B, S, E, H = 2, 8, 32, 4

    key = jax.random.PRNGKey(0)
    kx, k1, k2, k3, k4 = jax.random.split(key, 5)

    x = jax.random.normal(kx, (B, S, E), dtype=jnp.float32)
    # Deterministic synthetic parameters (nn.Linear-shaped, stored as (in, out)).
    w_qkv = 0.02 * jax.random.normal(k1, (E, 3 * E), dtype=jnp.float32)
    b_qkv = 0.02 * jax.random.normal(k2, (3 * E,), dtype=jnp.float32)
    w_proj = 0.02 * jax.random.normal(k3, (E, E), dtype=jnp.float32)
    b_proj = 0.02 * jax.random.normal(k4, (E,), dtype=jnp.float32)

    out = multi_head_attention(x, w_qkv, b_qkv, w_proj, b_proj, num_heads=H)
    out = jax.block_until_ready(out)
    ref = _reference_mha(x, w_qkv, b_qkv, w_proj, b_proj, H)
    assert out.shape == (B, S, E)
    # 1e-3 tolerance covers the approx-reciprocal softmax denominator.
    assert jnp.allclose(out, ref, atol=1e-3, rtol=1e-3), "mismatch vs reference"

    # Second case exercises the key-padding (additive bias) path: S=6 pads to 8.
    S2 = 6
    x2 = jax.random.normal(jax.random.PRNGKey(1), (B, S2, E), dtype=jnp.float32)
    out2 = jax.block_until_ready(
        multi_head_attention(x2, w_qkv, b_qkv, w_proj, b_proj, num_heads=H))
    ref2 = _reference_mha(x2, w_qkv, b_qkv, w_proj, b_proj, H)
    assert out2.shape == (B, S2, E)
    assert jnp.allclose(out2, ref2, atol=1e-3, rtol=1e-3), "masked mismatch"

    print("KERNEL_OK")
</pallas_src>

<mosaic_0001>
module attributes {stable_mosaic.version = 11 : i64} {
  func.func @_qkv_kernel(%arg0: i32, %arg1: i32, %arg2: memref<1x8x32xf32, #tpu.memory_space<vmem>>, %arg3: memref<32x96xf32, #tpu.memory_space<vmem>>, %arg4: memref<1x96xf32, #tpu.memory_space<vmem>>, %arg5: memref<1x8x96xf32, #tpu.memory_space<vmem>>) attributes {dimension_semantics = [#tpu.dimension_semantics<parallel>, #tpu.dimension_semantics<parallel>], iteration_bounds = array<i64: 2, 1>, scalar_prefetch = 0 : i64, scratch_operands = 0 : i64, tpu.core_type = #tpu.core_type<tc>, window_params = [{transform_indices = @transform_0, window_bounds = array<i64: 1, 8, 32>}, {pipeline_mode = #tpu.pipeline_mode<synchronous>, transform_indices = @transform_1, window_bounds = array<i64: 32, 96>}, {pipeline_mode = #tpu.pipeline_mode<synchronous>, transform_indices = @transform_2, window_bounds = array<i64: 1, 96>}, {transform_indices = @transform_3, window_bounds = array<i64: 1, 8, 96>}]} {
    %c0 = arith.constant 0 : index
    %c0_0 = arith.constant 0 : index
    %c0_1 = arith.constant 0 : index
    %0 = vector.load %arg2[%c0, %c0_0, %c0_1] : memref<1x8x32xf32, #tpu.memory_space<vmem>>, vector<1x8x32xf32>
    %1 = vector.shape_cast %0 : vector<1x8x32xf32> to vector<8x32xf32>
    %c0_2 = arith.constant 0 : index
    %c0_3 = arith.constant 0 : index
    %2 = vector.load %arg3[%c0_2, %c0_3] : memref<32x96xf32, #tpu.memory_space<vmem>>, vector<32x96xf32>
    %cst = arith.constant dense<0.000000e+00> : vector<8x96xf32>
    %3 = tpu.matmul %1, %2, %cst {dimension_numbers = #tpu.dot_dimension_numbers<[1], [0], [0], [1], [0, 0, 1, 1], [], []>} : vector<8x32xf32>, vector<32x96xf32>, vector<8x96xf32> -> vector<8x96xf32>
    %c0_4 = arith.constant 0 : index
    %c0_5 = arith.constant 0 : index
    %4 = vector.load %arg4[%c0_4, %c0_5] : memref<1x96xf32, #tpu.memory_space<vmem>>, vector<1x96xf32>
    %5 = vector.broadcast %4 : vector<1x96xf32> to vector<8x96xf32>
    %6 = arith.addf %3, %5 : vector<8x96xf32>
    %c0_6 = arith.constant 0 : index
    %c0_7 = arith.constant 0 : index
    %c0_8 = arith.constant 0 : index
    %7 = vector.load %arg5[%c0_6, %c0_7, %c0_8] : memref<1x8x96xf32, #tpu.memory_space<vmem>>, vector<1x8x96xf32>
    %8 = vector.shape_cast %7 : vector<1x8x96xf32> to vector<8x96xf32>
    %9 = vector.shape_cast %6 : vector<8x96xf32> to vector<1x8x96xf32>
    tpu.vector_store %arg5[%c0_6, %c0_7, %c0_8], %9 {strides = array<i32>} : memref<1x8x96xf32, #tpu.memory_space<vmem>>, vector<1x8x96xf32>,
    return
  }
  func.func @transform_0(%arg0: i32, %arg1: i32) -> (i32, i32, i32) {
    %c0_i32 = arith.constant 0 : i32
    %c0_i32_0 = arith.constant 0 : i32
    return %arg0, %arg1, %c0_i32 : i32, i32, i32
  }
  func.func @transform_1(%arg0: i32, %arg1: i32) -> (i32, i32) {
    %c0_i32 = arith.constant 0 : i32
    %c0_i32_0 = arith.constant 0 : i32
    %c0_i32_1 = arith.constant 0 : i32
    return %c0_i32, %c0_i32_0 : i32, i32
  }
  func.func @transform_2(%arg0: i32, %arg1: i32) -> (i32, i32) {
    %c0_i32 = arith.constant 0 : i32
    %c0_i32_0 = arith.constant 0 : i32
    %c0_i32_1 = arith.constant 0 : i32
    return %c0_i32, %c0_i32_0 : i32, i32
  }
  func.func @transform_3(%arg0: i32, %arg1: i32) -> (i32, i32, i32) {
    %c0_i32 = arith.constant 0 : i32
    %c0_i32_0 = arith.constant 0 : i32
    return %arg0, %arg1, %c0_i32 : i32, i32, i32
  }
}

module attributes {stable_mosaic.version = 11 : i64} {
  func.func @_qkv_kernel(%arg0: i32, %arg1: i32, %arg2: memref<1x8x32xf32, #tpu.memory_space<vmem>>, %arg3: memref<32x96xf32, #tpu.memory_space<vmem>>, %arg4: memref<1x96xf32, #tpu.memory_space<vmem>>, %arg5: memref<1x8x96xf32, #tpu.memory_space<vmem>>) attributes {dimension_semantics = [#tpu.dimension_semantics<parallel>, #tpu.dimension_semantics<parallel>], iteration_bounds = array<i64: 2, 1>, scalar_prefetch = 0 : i64, scratch_operands = 0 : i64, tpu.core_type = #tpu.core_type<tc>, window_params = [{transform_indices = @transform_0, window_bounds = array<i64: 1, 8, 32>}, {pipeline_mode = #tpu.pipeline_mode<synchronous>, transform_indices = @transform_1, window_bounds = array<i64: 32, 96>}, {pipeline_mode = #tpu.pipeline_mode<synchronous>, transform_indices = @transform_2, window_bounds = array<i64: 1, 96>}, {transform_indices = @transform_3, window_bounds = array<i64: 1, 8, 96>}]} {
    %c0 = arith.constant 0 : index
    %c0_0 = arith.constant 0 : index
    %c0_1 = arith.constant 0 : index
    %0 = vector.load %arg2[%c0, %c0_0, %c0_1] : memref<1x8x32xf32, #tpu.memory_space<vmem>>, vector<1x8x32xf32>
    %1 = vector.shape_cast %0 : vector<1x8x32xf32> to vector<8x32xf32>
    %c0_2 = arith.constant 0 : index
    %c0_3 = arith.constant 0 : index
    %2 = vector.load %arg3[%c0_2, %c0_3] : memref<32x96xf32, #tpu.memory_space<vmem>>, vector<32x96xf32>
    %cst = arith.constant dense<0.000000e+00> : vector<8x96xf32>
    %3 = tpu.matmul %1, %2, %cst {dimension_numbers = #tpu.dot_dimension_numbers<[1], [0], [0], [1], [0, 0, 1, 1], [], []>} : vector<8x32xf32>, vector<32x96xf32>, vector<8x96xf32> -> vector<8x96xf32>
    %c0_4 = arith.constant 0 : index
    %c0_5 = arith.constant 0 : index
    %4 = vector.load %arg4[%c0_4, %c0_5] : memref<1x96xf32, #tpu.memory_space<vmem>>, vector<1x96xf32>
    %5 = vector.broadcast %4 : vector<1x96xf32> to vector<8x96xf32>
    %6 = arith.addf %3, %5 : vector<8x96xf32>
    %c0_6 = arith.constant 0 : index
    %c0_7 = arith.constant 0 : index
    %c0_8 = arith.constant 0 : index
    %7 = vector.load %arg5[%c0_6, %c0_7, %c0_8] : memref<1x8x96xf32, #tpu.memory_space<vmem>>, vector<1x8x96xf32>
    %8 = vector.shape_cast %7 : vector<1x8x96xf32> to vector<8x96xf32>
    %9 = vector.shape_cast %6 : vector<8x96xf32> to vector<1x8x96xf32>
    tpu.vector_store %arg5[%c0_6, %c0_7, %c0_8], %9 {strides = array<i32>} : memref<1x8x96xf32, #tpu.memory_space<vmem>>, vector<1x8x96xf32>,
    return
  }
  func.func @transform_0(%arg0: i32, %arg1: i32) -> (i32, i32, i32) {
    %c0_i32 = arith.constant 0 : i32
    %c0_i32_0 = arith.constant 0 : i32
    return %arg0, %arg1, %c0_i32 : i32, i32, i32
  }
  func.func @transform_1(%arg0: i32, %arg1: i32) -> (i32, i32) {
    %c0_i32 = arith.constant 0 : i32
    %c0_i32_0 = arith.constant 0 : i32
    %c0_i32_1 = arith.constant 0 : i32
    return %c0_i32, %c0_i32_0 : i32, i32
  }
  func.func @transform_2(%arg0: i32, %arg1: i32) -> (i32, i32) {
    %c0_i32 = arith.constant 0 : i32
    %c0_i32_0 = arith.constant 0 : i32
    %c0_i32_1 = arith.constant 0 : i32
    return %c0_i32, %c0_i32_0 : i32, i32
  }
  func.func @transform_3(%arg0: i32, %arg1: i32) -> (i32, i32, i32) {
    %c0_i32 = arith.constant 0 : i32
    %c0_i32_0 = arith.constant 0 : i32
    return %arg0, %arg1, %c0_i32 : i32, i32, i32
  }
}

</mosaic_0001>

<bundles_post_ra>
// kernel: tpu_custom_call.1
= control target key start
LH: loop header
LB: loop body
LE: loop exit
PB: predicated region body
PF: predicated region fallthrough
CT: control target
= control target key end

     0   :  { %8 = vsyncpa [#allocation3], 0  ;;  %s773_s0 = inlined_call_operand.hbm [shape: f32[2,8,32], index: 0, kind: input, shape index: {}]   ;;  %s774_s1 = inlined_call_operand.hbm [shape: f32[32,96], index: 1, kind: input, shape index: {}]   ;;  %s775_s2 = inlined_call_operand.vmem [shape: f32[1,96], index: 2, kind: input, shape index: {}]   ;;  %s776_s3 = inlined_call_operand.hbm [shape: f32[2,8,96], index: 3, kind: output, shape index: {}]  }
   0x1   :  { %10 = vsyncpa [#allocation3 + $0x1], 0 }
   0x2   :  { %11 = vsyncpa [#allocation6], 0 }
   0x3   :  { %12 = vsyncpa [#allocation4], 0 }
   0x4   :  { %14 = vsyncpa [#allocation4 + $0x1], 0  ;;  %s627_s12 = smov 0   ;;  %s629_s13 = smov 0  }
   0x5   :  { %s631_s14 = smov 0   ;;  %s633_s15 = smov 0  }
   0x6   :  { %s635_s16 = smov 0   ;;  %s637_s17 = smov 0  }
   0x7 LB: > { %s364_s18 = sadd.s32 4294967295, %s602_s17   ;;  %p366_p0 = scmp.ge.s32.totalorder %s602_s17, 1  ;;  %s602_s17 = sphi %s637_s17, %s20_s17   ;;  %s598_s16 = sphi %s635_s16, %s787_s16   ;;  %s594_s15 = sphi %s633_s15, %s786_s15   ;;  %s590_s14 = sphi %s631_s14, %s785_s14   ;;  %s586_s13 = sphi %s629_s13, %s784_s13   ;;  %s582_s12 = sphi %s627_s12, %s783_s12  }
   0x8   : > { %p659_p1 = scmp.eq.s32.totalorder %s364_s18, 0  ;;  %p135_p2 = scmp.lt.s32.totalorder %s602_s17, 3 }
   0x9   : > { %s146_s22 = sshll.u32 %s774_s1, 4  ;;  %s604_s24 = smov [#allocation5]   ;;  %s147_s22 = int_to_ptr.hbm [resolvable:$true] %s146_s22 }
   0xa   : > { %p667_p3 = pnand %p366_p0, %p135_p2  ;;  %s148_s25 = sshll.u32 %s604_s24, 4  ;;  %s149_s25 = int_to_ptr.vmem [resolvable:$true] %s148_s25 }
   0xb   : > { %p368_p6 = scmp.ge.s32.totalorder %s602_s17, 2  ;;  %s605_s26 = smov 128  }
   0xc   : > { %p388_p4 = pneg %p667_p3  ;;  %s606_s27 = smov 8  }
   0xd   : > { %s365_s28 = sadd.s32 4294967294, %s602_s17   ;;  %s32_s29 = sadd.s32 1, %s598_s16 }
   0xe   : > { %p389_p5 = pnand %p388_p4, %p659_p1  ;;  %s41_s30 = sadd.s32 1, %s590_s14 }
   0xf   : > { %p34_p7 = scmp.ge.s32.totalorder %s32_s29, 2  ;;  %p48_p8 = scmp.ne.s32.totalorder %s590_s14, %s586_s13 }
  0x10   : > { %391 = dma.hbm_to_vmem [thread:$0]  (!%p389_p5), %s147_s22, 512, %s149_s25, [#allocation6], %s605_s26, %s605_s26, %s606_s27  }
  0x11   : > { %p49_p9 = scmp.eq.s32.totalorder %s602_s17, 0  ;;  %p54_p10 = scmp.ne.s32.totalorder %s586_s13, %s582_s12 }
  0x12   : > { %s789_s29 = smov (%p34_p7, %s32_s29), 0  ;;  %p122_p13 = scmp.eq.s32.totalorder %s364_s18, 1 }
  0x13   : > { %p686_p11 = por %p49_p9, %p48_p8  ;;  %p692_p12 = por %p659_p1, %p54_p10 }
  0x14   : > { %s36_s6 = ssub.s32 %s598_s16, %s789_s29  ;;  %p128_p2 = scmp.eq.s32.totalorder %s365_s28, 1 }
  0x15   : > { %p39_p0 = scmp.eq.s32.totalorder %s36_s6, 0  ;;  %p698_p4 = por %p122_p13, %p48_p8 }
  0x16   : > { %p401_p5 = scmp.lt.s32.totalorder %s602_s17, 2  ;;  %p706_p7 = por %p128_p2, %p54_p10 }
  0x17   : > { %s704_s8 = scalar_select %p39_p0, %s590_s14, %s41_s30  }
  0x18   : > { %s165_s10 = sand.u32 1, %s590_s14   ;;  %s370_s20 = sshll.u32 %s598_s16, 3 }
  0x19   : > { %s369_s11 = sshll.u32 %s165_s10, 3  ;;  %s174_s18 = scalar_lea.hbm %s773_s0, %s370_s20 }
  0x1a   : > { %s169_s24 = scalar_lea.vmem [#allocation2], %s369_s11  ;;  %s176_s26 = sshll.u32 %s174_s18, 4  ;;  %s177_s26 = int_to_ptr.hbm [resolvable:$true] %s176_s26 }
  0x1b   : > { %s178_s25 = sshll.u32 %s169_s24, 4  ;;  %p393_p8 = pnand %p401_p5, %p686_p11  ;;  %s179_s25 = int_to_ptr.vmem [resolvable:$true] %s178_s25 }
  0x1c   : > { %s166_s27 = scalar_lea.sflag [#allocation3], %s165_s10  ;;  %187 = sbr.rel (%p667_p3) target bundleno = 175 (0xaf), region = 32 }
  0x1d   : > { %395 = dma.hbm_to_vmem [thread:$0]  (!%p393_p8), %s177_s26, 128, %s179_s25, %s166_s27  }
  0x1e   : > { %s720_s28 = sand.u32 (!%p667_p3), 1, %s586_s13  }
  0x1f   : > { %s372_s30 = sshll.u32 (!%p667_p3), %s720_s28, 3  ;;  %s190_s6 = scalar_lea.sflag (!%p667_p3), [#allocation3], %s720_s28 }
  0x20   : > { %s193_s11 = scalar_lea.vmem (!%p667_p3), [#allocation2], %s372_s30 }
  0x21   : > { %569 = dma.done.wait (%p692_p12), %s190_s6, 128  }
  0x22   : > { %571 = vsyncadd (%p692_p12), %s190_s6, 4294967168 }
  0x23   : > { %573 = dma.done.wait (%p659_p1), [#allocation6], 512  }
  0x24   : > { %575 = vsyncadd (%p659_p1), [#allocation6], 4294966784  ;;  %v226_v0 = vld [vmem:[#allocation5 + $0x18] sm:$0xff]  ;;  %v225_v1 = vld [vmem:[#allocation5 + $0x10] sm:$0xff]  ;;  %vm231_vm0 = vcmask 261120   ;;  %s377_s23 = sshll.u32 %s594_s15, 3 }
  0x25   : > { %247 = vmatpush.msra.mxu0 %v226_v0  ;;  %v224_v2 = vld [vmem:[#allocation5 + $0x8] sm:$0xff]  ;;  %v223_v3 = vld [vmem:[#allocation5] sm:$0xff]  ;;  %v222_v4 = vld [vmem:[%s193_s11] sm:$0xff]  ;;  %s269_s10 = scalar_lea.hbm %s776_s3, %s377_s23  ;;  %s221_s21 = scalar_lea.vmem [#allocation7], %s372_s30  ;;  %vm255_vm1 = vcmask 785408  }
  0x26   : > { %v455_v5 = vld [vmem:[%s775_s2] ss:$0 sm:$0xff]  ;;  %s271_s22 = sshll.u32 %s221_s21, 4  ;;  %s273_s18 = sshll.u32 %s269_s10, 4  ;;  %s272_s22 = int_to_ptr.vmem [resolvable:$true] %s271_s22  ;;  %s274_s18 = int_to_ptr.hbm [resolvable:$true] %s273_s18 }
  0x27   : > { %248 = vmatpush.msra.mxu0 %v225_v1  ;;  %s258_s24 = scalar_lea.sflag [#allocation4], %s720_s28  ;;  %s530_s15 = sshra.s32 %s274_s18, 4  ;;  %s531_s15 = int_to_ptr.hbm [resolvable:$true] %s530_s15 }
  0x28   : > { %s532_s25 = scalar_lea.hbm %s531_s15, 8  ;;  %s536_s30 = scalar_lea.hbm %s776_s3, 16 }
  0x29   : > { %249 = vmatpush.msra.mxu0 %v224_v2  ;;  %p533_p1 = scmp.ne.s32.totalorder %s531_s15, %s532_s25  ;;  %p537_p10 = scmp.lt.s32.totalorder %s531_s15, %s776_s3 }
  0x2a   : > { %p538_p11 = scmp.lt.s32.totalorder %s536_s30, %s532_s25 }
  0x2b   : > { %250 = vmatpush.msra.mxu0 %v223_v3  ;;  %p534_p3 = pnand %p533_p1, %p698_p4 }
  0x2c   : > { %375 = vmatmul.msk.f32.vlgmr.msra.gmra.mxu0 %vm231_vm0, %v222_v4  ;;  %p539_p12 = por %p538_p11, %p537_p10 }
  0x2d   : > { %p535_p9 = pneg %p534_p3 }
  0x2f   : > { %p540_p13 = pnand %p539_p12, %p535_p9 }
  0xa9   : > { %v252_v6 = vpop.f32.mrf.mxu0 }
  0xaa   : > { %v253_v7 = vadd.f32 %v455_v5, %v252_v6 }
  0xac   : > { %256 = vst.msk [vmem:[%s221_s21] sm:$0xff] %vm255_vm1, %v253_v7 }
  0xad   : > { %543 = shalt.err (!%p540_p13)
}
  0xae   : > { %386 = dma.vmem_to_hbm [thread:$0]  (%p698_p4), %s272_s22, 128, %s274_s18, %s258_s24  }
  0xaf PF: > { %s285_s28 = sand.u32 1, %s582_s12   ;;  %p397_p0 = pnand %p368_p6, %p706_p7 }
  0xb0   : > { %s286_s23 = scalar_lea.sflag [#allocation4], %s285_s28 }
  0xb1   : > { %p398_p2 = pneg %p397_p0 }
  0xb3   : > { %577 = dma.done.wait (%p398_p2), %s286_s23, 128  }
  0xb4   : > { %579 = vsyncadd (%p398_p2), %s286_s23, 4294967168  ;;  %s20_s17 = sadd.s32 1, %s602_s17   ;;  %s783_s12 = smov %s586_s13 }
  0xb5   : > { %p17_p5 = scmp.ge.s32.totalorder %s20_s17, 4   ;;  %s784_s13 = smov %s590_s14 }
  0xb6   : > { %s785_s14 = smov %s704_s8  ;;  %s786_s15 = smov %s598_s16 }
  0xb7   : > { %s787_s16 = smov %s789_s29  ;;  %19 = sbr.rel (!%p17_p5) target bundleno = 7 (0x7), region = 81 }
  0xbc   :  { %292 = vsyncpa [#allocation3], 1 }
  0xbd   :  { %294 = vsyncpa [#allocation3 + $0x1], 1 }
  0xbe   :  { %295 = vsyncpa [#allocation6], 1 }
  0xbf   :  { %296 = vsyncpa [#allocation4], 1 }
  0xc0   :  { %298 = vsyncpa [#allocation4 + $0x1], 1 }

// kernel: tpu_custom_call.1
= control target key start
LH: loop header
LB: loop body
LE: loop exit
PB: predicated region body
PF: predicated region fallthrough
CT: control target
= control target key end

     0   :  { %8 = vsyncpa [#allocation3], 0  ;;  %s773_s0 = inlined_call_operand.hbm [shape: f32[2,8,32], index: 0, kind: input, shape index: {}]   ;;  %s774_s1 = inlined_call_operand.hbm [shape: f32[32,96], index: 1, kind: input, shape index: {}]   ;;  %s775_s2 = inlined_call_operand.vmem [shape: f32[1,96], index: 2, kind: input, shape index: {}]   ;;  %s776_s3 = inlined_call_operand.hbm [shape: f32[2,8,96], index: 3, kind: output, shape index: {}]  }
   0x1   :  { %10 = vsyncpa [#allocation3 + $0x1], 0 }
   0x2   :  { %11 = vsyncpa [#allocation6], 0 }
   0x3   :  { %12 = vsyncpa [#allocation4], 0 }
   0x4   :  { %14 = vsyncpa [#allocation4 + $0x1], 0  ;;  %s627_s12 = smov 0   ;;  %s629_s13 = smov 0  }
   0x5   :  { %s631_s14 = smov 0   ;;  %s633_s15 = smov 0  }
   0x6   :  { %s635_s16 = smov 0   ;;  %s637_s17 = smov 0  }
   0x7 LB: > { %s364_s18 = sadd.s32 4294967295, %s602_s17   ;;  %p366_p0 = scmp.ge.s32.totalorder %s602_s17, 1  ;;  %s602_s17 = sphi %s637_s17, %s20_s17   ;;  %s598_s16 = sphi %s635_s16, %s787_s16   ;;  %s594_s15 = sphi %s633_s15, %s786_s15   ;;  %s590_s14 = sphi %s631_s14, %s785_s14   ;;  %s586_s13 = sphi %s629_s13, %s784_s13   ;;  %s582_s12 = sphi %s627_s12, %s783_s12  }
   0x8   : > { %p659_p1 = scmp.eq.s32.totalorder %s364_s18, 0  ;;  %p135_p2 = scmp.lt.s32.totalorder %s602_s17, 3 }
   0x9   : > { %s146_s22 = sshll.u32 %s774_s1, 4  ;;  %s604_s24 = smov [#allocation5]   ;;  %s147_s22 = int_to_ptr.hbm [resolvable:$true] %s146_s22 }
   0xa   : > { %p667_p3 = pnand %p366_p0, %p135_p2  ;;  %s148_s25 = sshll.u32 %s604_s24, 4  ;;  %s149_s25 = int_to_ptr.vmem [resolvable:$true] %s148_s25 }
   0xb   : > { %p368_p6 = scmp.ge.s32.totalorder %s602_s17, 2  ;;  %s605_s26 = smov 128  }
   0xc   : > { %p388_p4 = pneg %p667_p3  ;;  %s606_s27 = smov 8  }
   0xd   : > { %s365_s28 = sadd.s32 4294967294, %s602_s17   ;;  %s32_s29 = sadd.s32 1, %s598_s16 }
   0xe   : > { %p389_p5 = pnand %p388_p4, %p659_p1  ;;  %s41_s30 = sadd.s32 1, %s590_s14 }
   0xf   : > { %p34_p7 = scmp.ge.s32.totalorder %s32_s29, 2  ;;  %p48_p8 = scmp.ne.s32.totalorder %s590_s14, %s586_s13 }
  0x10   : > { %391 = dma.hbm_to_vmem [thread:$0]  (!%p389_p5), %s147_s22, 512, %s149_s25, [#allocation6], %s605_s26, %s605_s26, %s606_s27  }
  0x11   : > { %p49_p9 = scmp.eq.s32.totalorder %s602_s17, 0  ;;  %p54_p10 = scmp.ne.s32.totalorder %s586_s13, %s582_s12 }
  0x12   : > { %s789_s29 = smov (%p34_p7, %s32_s29), 0  ;;  %p122_p13 = scmp.eq.s32.totalorder %s364_s18, 1 }
  0x13   : > { %p686_p11 = por %p49_p9, %p48_p8  ;;  %p692_p12 = por %p659_p1, %p54_p10 }
  0x14   : > { %s36_s6 = ssub.s32 %s598_s16, %s789_s29  ;;  %p128_p2 = scmp.eq.s32.totalorder %s365_s28, 1 }
  0x15   : > { %p39_p0 = scmp.eq.s32.totalorder %s36_s6, 0  ;;  %p698_p4 = por %p122_p13, %p48_p8 }
  0x16   : > { %p401_p5 = scmp.lt.s32.totalorder %s602_s17, 2  ;;  %p706_p7 = por %p128_p2, %p54_p10 }
  0x17   : > { %s704_s8 = scalar_select %p39_p0, %s590_s14, %s41_s30  }
  0x18   : > { %s165_s10 = sand.u32 1, %s590_s14   ;;  %s370_s20 = sshll.u32 %s598_s16, 3 }
  0x19   : > { %s369_s11 = sshll.u32 %s165_s10, 3  ;;  %s174_s18 = scalar_lea.hbm %s773_s0, %s370_s20 }
  0x1a   : > { %s169_s24 = scalar_lea.vmem [#allocation2], %s369_s11  ;;  %s176_s26 = sshll.u32 %s174_s18, 4  ;;  %s177_s26 = int_to_ptr.hbm [resolvable:$true] %s176_s26 }
  0x1b   : > { %s178_s25 = sshll.u32 %s169_s24, 4  ;;  %p393_p8 = pnand %p401_p5, %p686_p11  ;;  %s179_s25 = int_to_ptr.vmem [resolvable:$true] %s178_s25 }
  0x1c   : > { %s166_s27 = scalar_lea.sflag [#allocation3], %s165_s10  ;;  %187 = sbr.rel (%p667_p3) target bundleno = 175 (0xaf), region = 32 }
  0x1d   : > { %395 = dma.hbm_to_vmem [thread:$0]  (!%p393_p8), %s177_s26, 128, %s179_s25, %s166_s27  }
  0x1e   : > { %s720_s28 = sand.u32 (!%p667_p3), 1, %s586_s13  }
  0x1f   : > { %s372_s30 = sshll.u32 (!%p667_p3), %s720_s28, 3  ;;  %s190_s6 = scalar_lea.sflag (!%p667_p3), [#allocation3], %s720_s28 }
  0x20   : > { %s193_s11 = scalar_lea.vmem (!%p667_p3), [#allocation2], %s372_s30 }
  0x21   : > { %569 = dma.done.wait (%p692_p12), %s190_s6, 128  }
  0x22   : > { %571 = vsyncadd (%p692_p12), %s190_s6, 4294967168 }
  0x23   : > { %573 = dma.done.wait (%p659_p1), [#allocation6], 512  }
  0x24   : > { %575 = vsyncadd (%p659_p1), [#allocation6], 4294966784  ;;  %v226_v0 = vld [vmem:[#allocation5 + $0x18] sm:$0xff]  ;;  %v225_v1 = vld [vmem:[#allocation5 + $0x10] sm:$0xff]  ;;  %vm231_vm0 = vcmask 261120   ;;  %s377_s23 = sshll.u32 %s594_s15, 3 }
  0x25   : > { %247 = vmatpush.msra.mxu0 %v226_v0  ;;  %v224_v2 = vld [vmem:[#allocation5 + $0x8] sm:$0xff]  ;;  %v223_v3 = vld [vmem:[#allocation5] sm:$0xff]  ;;  %v222_v4 = vld [vmem:[%s193_s11] sm:$0xff]  ;;  %s269_s10 = scalar_lea.hbm %s776_s3, %s377_s23  ;;  %s221_s21 = scalar_lea.vmem [#allocation7], %s372_s30  ;;  %vm255_vm1 = vcmask 785408  }
  0x26   : > { %v455_v5 = vld [vmem:[%s775_s2] ss:$0 sm:$0xff]  ;;  %s271_s22 = sshll.u32 %s221_s21, 4  ;;  %s273_s18 = sshll.u32 %s269_s10, 4  ;;  %s272_s22 = int_to_ptr.vmem [resolvable:$true] %s271_s22  ;;  %s274_s18 = int_to_ptr.hbm [resolvable:$true] %s273_s18 }
  0x27   : > { %248 = vmatpush.msra.mxu0 %v225_v1  ;;  %s258_s24 = scalar_lea.sflag [#allocation4], %s720_s28  ;;  %s530_s15 = sshra.s32 %s274_s18, 4  ;;  %s531_s15 = int_to_ptr.hbm [resolvable:$true] %s530_s15 }
  0x28   : > { %s532_s25 = scalar_lea.hbm %s531_s15, 8  ;;  %s536_s30 = scalar_lea.hbm %s776_s3, 16 }
  0x29   : > { %249 = vmatpush.msra.mxu0 %v224_v2  ;;  %p533_p1 = scmp.ne.s32.totalorder %s531_s15, %s532_s25  ;;  %p537_p10 = scmp.lt.s32.totalorder %s531_s15, %s776_s3 }
  0x2a   : > { %p538_p11 = scmp.lt.s32.totalorder %s536_s30, %s532_s25 }
  0x2b   : > { %250 = vmatpush.msra.mxu0 %v223_v3  ;;  %p534_p3 = pnand %p533_p1, %p698_p4 }
  0x2c   : > { %375 = vmatmul.msk.f32.vlgmr.msra.gmra.mxu0 %vm231_vm0, %v222_v4  ;;  %p539_p12 = por %p538_p11, %p537_p10 }
  0x2d   : > { %p535_p9 = pneg %p534_p3 }
  0x2f   : > { %p540_p13 = pnand %p539_p12, %p535_p9 }
  0xa9   : > { %v252_v6 = vpop.f32.mrf.mxu0 }
  0xaa   : > { %v253_v7 = vadd.f32 %v455_v5, %v252_v6 }
  0xac   : > { %256 = vst.msk [vmem:[%s221_s21] sm:$0xff] %vm255_vm1, %v253_v7 }
  0xad   : > { %543 = shalt.err (!%p540_p13)
}
  0xae   : > { %386 = dma.vmem_to_hbm [thread:$0]  (%p698_p4), %s272_s22, 128, %s274_s18, %s258_s24  }
  0xaf PF: > { %s285_s28 = sand.u32 1, %s582_s12   ;;  %p397_p0 = pnand %p368_p6, %p706_p7 }
  0xb0   : > { %s286_s23 = scalar_lea.sflag [#allocation4], %s285_s28 }
  0xb1   : > { %p398_p2 = pneg %p397_p0 }
  0xb3   : > { %577 = dma.done.wait (%p398_p2), %s286_s23, 128  }
  0xb4   : > { %579 = vsyncadd (%p398_p2), %s286_s23, 4294967168  ;;  %s20_s17 = sadd.s32 1, %s602_s17   ;;  %s783_s12 = smov %s586_s13 }
  0xb5   : > { %p17_p5 = scmp.ge.s32.totalorder %s20_s17, 4   ;;  %s784_s13 = smov %s590_s14 }
  0xb6   : > { %s785_s14 = smov %s704_s8  ;;  %s786_s15 = smov %s598_s16 }
  0xb7   : > { %s787_s16 = smov %s789_s29  ;;  %19 = sbr.rel (!%p17_p5) target bundleno = 7 (0x7), region = 81 }
  0xbc   :  { %292 = vsyncpa [#allocation3], 1 }
  0xbd   :  { %294 = vsyncpa [#allocation3 + $0x1], 1 }
  0xbe   :  { %295 = vsyncpa [#allocation6], 1 }
  0xbf   :  { %296 = vsyncpa [#allocation4], 1 }
  0xc0   :  { %298 = vsyncpa [#allocation4 + $0x1], 1 }

</bundles_post_ra>
